<compile_context>
chip_gen: v5e
topology: v5e:2x2
jax: 0.10.0
libtpu: 0.0.40
codegen_flags: <defaults>
</compile_context>

<pallas_src>
import jax
import jax.numpy as jnp
from jax.experimental import pallas as pl
from jax.experimental.pallas import tpu as pltpu


LANE = 128
KPAD = 16      # bf16 sublane pack: keep every MXU contraction dim a multiple of 16


def _round_up(x, m):
    return ((x + m - 1) // m) * m


# ----------------------------- Pallas kernel -----------------------------

def _make_mlp_kernel(n_layers, nsample):
    def kernel(*refs):
        g_ref = refs[0]           # (1, TILE_P*S, Cin16)       bf16
        out_ref = refs[-1]        # (1, TILE_P, Cout_last128)  f32
        x = g_ref[0]              # (M, Cin16) bf16, M = TILE_P * S
        y = None
        for li in range(n_layers):
            w = refs[1 + 2 * li][...]    # (K_l, N_l) bf16
            b = refs[2 + 2 * li][...]    # (1, N_l)   f32
            # 1x1 Conv2d == channel matmul on the MXU; eval-mode BN folded into w/b.
            y = jnp.dot(x, w, preferred_element_type=jnp.float32)    # f32 accumulate
            y = jnp.maximum(y + b, 0.0)                              # bias + ReLU in f32
            if li < n_layers - 1:
                x = y.astype(jnp.bfloat16)                           # bf16 MXU input
        tp = out_ref.shape[1]
        cout = out_ref.shape[2]
        # F.max_pool2d(kernel_size=[1, nsample]).squeeze(-1): max over the sample axis.
        # nsample is a multiple of 8, so the reshape is a free sublane split.
        out_ref[0] = jnp.max(y.reshape(tp, nsample, cout), axis=1)
    return kernel


def _vmem_profile():
    """Generation-gated VMEM budget / scoped limit / tile cap."""
    try:
        info = pltpu.get_tpu_info()
        vmem_cap = int(getattr(info, "vmem_capacity_bytes", 0) or 0)
    except Exception:
        vmem_cap = 0                      # unknown -> be conservative (v7x-safe)
    if vmem_cap >= (100 << 20):           # v5e / v6e: 128 MiB VMEM
        return {"budget": 24 << 20, "limit": 64 << 20, "tile_cap": 512}
    # v7x (64 MiB VMEM) or unknown: stay inside the 32 MiB scoped default
    return {"budget": 8 << 20, "limit": 32 << 20, "tile_cap": 256}


def _choose_tile_p(B, P, S, cout_last_pad, budget_bytes, tile_cap):
    """Largest sublane-aligned divisor of P that fits the VMEM budget while keeping
    enough grid steps for pipelining / megacore (>=2 so both v7x TCs get work)."""
    def fits(t):
        # Narrow (<128-lane) blocks still occupy full 128-lane native tiles in VMEM,
        # so bytes/row are counted at 128 lanes regardless of the real channel count.
        in_b = 2 * t * S * LANE * 2           # double-buffered bf16 input tile
        act_b = t * S * LANE * (4 + 2)        # f32 activation + bf16 inter-layer copy
        out_b = 2 * t * cout_last_pad * 4     # double-buffered f32 pooled output
        return in_b + act_b + out_b <= budget_bytes

    cands = [t for t in range(8, min(P, tile_cap) + 1, 8) if P % t == 0 and fits(t)]
    if not cands:
        return P     # full-extent block on the npoint axis: always a legal BlockSpec
    for min_steps in (4, 2, 1):
        ok = [t for t in cands if B * (P // t) >= min_steps]
        if ok:
            return max(ok)
    return max(cands)


def mlp_and_maxpool(grouped, w_pads, b_pads):
    """grouped: (B, P, S, Cin16) bf16 -> (B, P, Cout_last128) f32 via Pallas."""
    B, P, S, Cin = grouped.shape
    n_layers = len(w_pads)
    cout_last_pad = w_pads[-1].shape[1]

    prof = _vmem_profile()
    tile_p = _choose_tile_p(B, P, S, cout_last_pad, prof["budget"], prof["tile_cap"])
    grouped_flat = grouped.reshape(B, P * S, Cin)    # contiguous rows -> dense DMA

    in_specs = [pl.BlockSpec((1, tile_p * S, Cin), lambda b, p: (b, p, 0))]
    operands = [grouped_flat]
    for w, bvec in zip(w_pads, b_pads):
        in_specs.append(pl.BlockSpec(w.shape, lambda b, p: (0, 0)))
        in_specs.append(pl.BlockSpec(bvec.shape, lambda b, p: (0, 0)))
        operands.append(w)
        operands.append(bvec)

    return pl.pallas_call(
        _make_mlp_kernel(n_layers, S),
        out_shape=jax.ShapeDtypeStruct((B, P, cout_last_pad), jnp.float32),
        grid=(B, P // tile_p),
        in_specs=in_specs,
        out_specs=pl.BlockSpec((1, tile_p, cout_last_pad), lambda b, p: (b, p, 0)),
        compiler_params=pltpu.CompilerParams(
            dimension_semantics=("parallel", "parallel"),
            vmem_limit_bytes=prof["limit"],
        ),
    )(*operands)


# ------------------------------- JAX glue --------------------------------

def ball_query(radius, nsample, xyz, new_xyz):
    """xyz: (B, N, 3), new_xyz: (B, P, 3) -> idx (B, P, nsample) int32.
    Matches pointnet2 CUDA ball_query: first `nsample` indices (ascending) within
    radius; missing slots filled with the first found index; 0 if none found.
    Sort-free: mask + cumsum rank + scatter (O(B*P*N))."""
    # TODO(synk): for very large N (esp. v5e) the (B,P,N) distance matrix should be
    # tiled or moved into a Pallas kernel instead of being materialized by XLA.
    B, N, _ = xyz.shape
    P = new_xyz.shape[1]
    d2 = jnp.sum((new_xyz[:, :, None, :] - xyz[:, None, :, :]) ** 2, axis=-1)   # (B,P,N)
    within = d2 < (radius * radius)
    rank = jnp.cumsum(within.astype(jnp.int32), axis=-1) - 1                    # rank among in-radius
    slot = jnp.where(within & (rank < nsample), rank, nsample)                  # nsample -> dropped
    b_ix = jnp.arange(B, dtype=jnp.int32)[:, None, None]
    p_ix = jnp.arange(P, dtype=jnp.int32)[None, :, None]
    src = jnp.broadcast_to(jnp.arange(N, dtype=jnp.int32), (B, P, N))
    idx = jnp.full((B, P, nsample), N, dtype=jnp.int32)
    idx = idx.at[b_ix, p_ix, slot].set(src, mode="drop")
    first = idx[:, :, :1]
    first = jnp.where(first >= N, 0, first)
    idx = jnp.where(idx >= N, first, idx)
    return idx


def build_grouped(xyz, new_xyz, features_bnc, idx, cin_pad):
    """Channels-last grouped tensor (B, P, S, cin_pad) bf16: [rel_xyz, features, 0-pad]."""
    # TODO(synk): the grouping gather is still materialized in HBM by XLA; fusing the
    # data-dependent gather into the Pallas kernel (idx via scalar prefetch + DMA/VMEM
    # gather) would remove the remaining extra HBM round-trip of the grouped tensor.
    B, P, S = idx.shape
    C = features_bnc.shape[-1]
    pts = jnp.concatenate([xyz, features_bnc], axis=-1)                               # (B, N, 3+C)
    gathered = jnp.take_along_axis(pts[:, None, :, :], idx[..., None], axis=2)         # (B, P, S, 3+C)
    offset = jnp.concatenate([new_xyz, jnp.zeros((B, P, C), new_xyz.dtype)], axis=-1)  # (B, P, 3+C)
    grouped = gathered - offset[:, :, None, :]        # relative xyz; features untouched
    cin = grouped.shape[-1]
    if cin_pad != cin:
        grouped = jnp.pad(grouped, ((0, 0), (0, 0), (0, 0), (0, cin_pad - cin)))
    # NOTE: bf16 grouped values are fine for radius-local / normalized coordinates;
    # large-magnitude raw coordinates would lose precision vs a pure-f32 reference.
    return grouped.astype(jnp.bfloat16)


def _sample_and_group(xyz, features, num_points, radius, nsample, cin_pad):
    B = xyz.shape[0]
    sample_idxs = jnp.tile(jnp.arange(num_points, dtype=jnp.int32)[None, :], (B, 1))
    new_xyz = jnp.take_along_axis(xyz, sample_idxs[..., None], axis=1)       # (B, P, 3)
    idx = ball_query(radius, nsample, xyz, new_xyz)                          # (B, P, S)
    s_pad = _round_up(nsample, 8)
    if s_pad != nsample:
        # Replicate the first in-radius index: duplicates don't change the max-pool,
        # and the kernel epilogue reshape stays a free sublane split (S multiple of 8).
        idx = jnp.concatenate(
            [idx, jnp.repeat(idx[:, :, :1], s_pad - nsample, axis=2)], axis=2)
    features_bnc = jnp.transpose(features, (0, 2, 1))                        # (B, N, C)
    grouped = build_grouped(xyz, new_xyz, features_bnc, idx, cin_pad)        # (B,P,Spad,Cin16)
    return new_xyz, sample_idxs, grouped


def init_params(key, mlps, dtype=jnp.float32):
    """Deterministic Conv2d(1x1) + BatchNorm2d parameters, BN folded into conv.
    BN uses eval-mode running stats (gamma=1, beta=0, mean=0, var=1, eps=1e-5)."""
    # TODO(synk): training-mode BatchNorm (batch statistics) not implemented; eval-mode folded.
    in_ch = mlps[0] + 3
    eps = 1e-5
    params = []
    for out_ch in mlps[1:]:
        key, kw, kb = jax.random.split(key, 3)
        w = jax.random.normal(kw, (out_ch, in_ch), dtype) * 0.1   # Conv2d weight (Cout, Cin, 1, 1) squeezed
        b = jax.random.normal(kb, (out_ch,), dtype) * 0.1         # Conv2d bias
        gamma = jnp.ones((out_ch,), dtype)
        beta = jnp.zeros((out_ch,), dtype)
        rmean = jnp.zeros((out_ch,), dtype)
        rvar = jnp.ones((out_ch,), dtype)
        scale = gamma / jnp.sqrt(rvar + eps)
        shift = beta - rmean * scale
        w_eff = (w * scale[:, None]).T                            # (Cin, Cout) f32
        b_eff = (b * scale + shift).reshape(1, out_ch)            # (1, Cout)   f32
        params.append((w_eff, b_eff))
        in_ch = out_ch
    return params


def pad_params(params):
    """Channel padding: MXU contraction dims (Cin and intermediate Cout) only to a
    multiple of 16 (bf16 sublane pack); only the final, STORED Cout to the 128-lane
    width. Weights cast to bf16, biases kept f32."""
    n = len(params)
    w_pads, b_pads = [], []
    cin_p = _round_up(params[0][0].shape[0], KPAD)
    for li, (w, b) in enumerate(params):
        cin, cout = w.shape
        cout_p = _round_up(cout, LANE) if li == n - 1 else _round_up(cout, KPAD)
        w_pads.append(jnp.pad(w, ((0, cin_p - cin), (0, cout_p - cout))).astype(jnp.bfloat16))
        b_pads.append(jnp.pad(b, ((0, 0), (0, cout_p - cout))).astype(jnp.float32))
        cin_p = cout_p
    cout_last = params[-1][0].shape[1]
    return w_pads, b_pads, cout_last


def pointnet_set_abstraction(xyz, features, num_points, params, radius, nsample,
                             use_fps=False):
    """xyz: (B, N, 3); features: (B, C, N) (PyTorch layout)."""
    if use_fps:
        # TODO(synk): furthest_point_sample (FPS) not implemented; use_fps=False path only.
        raise NotImplementedError("FPS sampling not implemented")
    w_pads, b_pads, cout_last = pad_params(params)
    cin_pad = w_pads[0].shape[0]
    new_xyz, sample_idxs, grouped = _sample_and_group(
        xyz, features, num_points, radius, nsample, cin_pad)
    feats = mlp_and_maxpool(grouped, w_pads, b_pads)                         # (B, P, Cout128) f32
    new_features = jnp.transpose(feats[:, :, :cout_last], (0, 2, 1))         # (B, Cout, P) PyTorch layout
    return new_xyz, new_features, sample_idxs


# ------------------------------ reference --------------------------------

def _reference_mlp_maxpool(grouped_bf16, w_pads, b_pads):
    """Pure-JAX mirror of the kernel math (bf16 matmul inputs, f32 accumulation)."""
    x = grouped_bf16                                                # (B, P, S, Cin16)
    n = len(w_pads)
    for li, (w, b) in enumerate(zip(w_pads, b_pads)):
        y = jnp.einsum("bpsc,cd->bpsd", x.astype(jnp.float32), w.astype(jnp.float32)) + b[0]
        y = jnp.maximum(y, 0.0)
        x = y.astype(jnp.bfloat16) if li < n - 1 else y
    return jnp.max(x, axis=2)                                       # (B, P, Cout_pad)


if __name__ == "__main__":
    key = jax.random.PRNGKey(0)
    B, N, C = 2, 32, 4
    num_points, nsample, radius = 8, 16, 0.8
    mlps = [C, 16, 32]

    key, kx, kf, kp = jax.random.split(key, 4)
    xyz = jax.random.uniform(kx, (B, N, 3), dtype=jnp.float32)        # points in unit cube
    features = jax.random.normal(kf, (B, C, N), dtype=jnp.float32)    # PyTorch (B, C, N)
    params = init_params(kp, mlps)

    new_xyz, new_features, sample_idxs = pointnet_set_abstraction(
        xyz, features, num_points, params, radius, nsample, use_fps=False)
    jax.block_until_ready((new_xyz, new_features, sample_idxs))

    # sanity check of the Pallas hot path against a pure-JAX reference with matching precision
    w_pads, b_pads, cout_last = pad_params(params)
    _, _, grouped = _sample_and_group(xyz, features, num_points, radius, nsample,
                                      w_pads[0].shape[0])
    ref = _reference_mlp_maxpool(grouped, w_pads, b_pads)[:, :, :cout_last]
    ref = jnp.transpose(ref, (0, 2, 1))                               # (B, Cout, P)

    assert new_xyz.shape == (B, num_points, 3)
    assert new_features.shape == (B, mlps[-1], num_points)
    assert sample_idxs.shape == (B, num_points)
    assert jnp.allclose(new_features, ref, atol=2e-3, rtol=2e-3)

    print("KERNEL_OK")
</pallas_src>

<mosaic_0001>
module attributes {stable_mosaic.version = 11 : i64} {
  func.func @kernel(%arg0: i32, %arg1: i32, %arg2: memref<1x128x16xbf16, #tpu.memory_space<vmem>>, %arg3: memref<16x16xbf16, #tpu.memory_space<vmem>>, %arg4: memref<1x16xf32, #tpu.memory_space<vmem>>, %arg5: memref<16x128xbf16, #tpu.memory_space<vmem>>, %arg6: memref<1x128xf32, #tpu.memory_space<vmem>>, %arg7: memref<1x8x128xf32, #tpu.memory_space<vmem>>) attributes {dimension_semantics = [#tpu.dimension_semantics<parallel>, #tpu.dimension_semantics<parallel>], iteration_bounds = array<i64: 2, 1>, scalar_prefetch = 0 : i64, scratch_operands = 0 : i64, tpu.core_type = #tpu.core_type<tc>, window_params = [{transform_indices = @transform_0, window_bounds = array<i64: 1, 128, 16>}, {pipeline_mode = #tpu.pipeline_mode<synchronous>, transform_indices = @transform_1, window_bounds = array<i64: 16, 16>}, {pipeline_mode = #tpu.pipeline_mode<synchronous>, transform_indices = @transform_2, window_bounds = array<i64: 1, 16>}, {pipeline_mode = #tpu.pipeline_mode<synchronous>, transform_indices = @transform_3, window_bounds = array<i64: 16, 128>}, {pipeline_mode = #tpu.pipeline_mode<synchronous>, transform_indices = @transform_4, window_bounds = array<i64: 1, 128>}, {transform_indices = @transform_5, window_bounds = array<i64: 1, 8, 128>}]} {
    %c0 = arith.constant 0 : index
    %c0_0 = arith.constant 0 : index
    %c0_1 = arith.constant 0 : index
    %0 = vector.load %arg2[%c0, %c0_0, %c0_1] : memref<1x128x16xbf16, #tpu.memory_space<vmem>>, vector<1x128x16xbf16>
    %1 = vector.shape_cast %0 : vector<1x128x16xbf16> to vector<128x16xbf16>
    %c0_2 = arith.constant 0 : index
    %c0_3 = arith.constant 0 : index
    %2 = vector.load %arg3[%c0_2, %c0_3] : memref<16x16xbf16, #tpu.memory_space<vmem>>, vector<16x16xbf16>
    %c0_4 = arith.constant 0 : index
    %c0_5 = arith.constant 0 : index
    %3 = vector.load %arg4[%c0_4, %c0_5] : memref<1x16xf32, #tpu.memory_space<vmem>>, vector<1x16xf32>
    %cst = arith.constant dense<0.000000e+00> : vector<128x16xf32>
    %4 = tpu.matmul %1, %2, %cst {dimension_numbers = #tpu.dot_dimension_numbers<[1], [0], [0], [1], [0, 0, 1, 1], [], []>} : vector<128x16xbf16>, vector<16x16xbf16>, vector<128x16xf32> -> vector<128x16xf32>
    %5 = vector.broadcast %3 : vector<1x16xf32> to vector<128x16xf32>
    %6 = arith.addf %4, %5 : vector<128x16xf32>
    %cst_6 = arith.constant 0.000000e+00 : f32
    %7 = vector.broadcast %cst_6 : f32 to vector<128x16xf32>
    %8 = arith.maximumf %6, %7 : vector<128x16xf32>
    %9 = arith.truncf %8 : vector<128x16xf32> to vector<128x16xbf16>
    %c0_7 = arith.constant 0 : index
    %c0_8 = arith.constant 0 : index
    %10 = vector.load %arg5[%c0_7, %c0_8] : memref<16x128xbf16, #tpu.memory_space<vmem>>, vector<16x128xbf16>
    %c0_9 = arith.constant 0 : index
    %c0_10 = arith.constant 0 : index
    %11 = vector.load %arg6[%c0_9, %c0_10] : memref<1x128xf32, #tpu.memory_space<vmem>>, vector<1x128xf32>
    %cst_11 = arith.constant dense<0.000000e+00> : vector<128x128xf32>
    %12 = tpu.matmul %9, %10, %cst_11 {dimension_numbers = #tpu.dot_dimension_numbers<[1], [0], [0], [1], [0, 0, 1, 1], [], []>} : vector<128x16xbf16>, vector<16x128xbf16>, vector<128x128xf32> -> vector<128x128xf32>
    %13 = vector.broadcast %11 : vector<1x128xf32> to vector<128x128xf32>
    %14 = arith.addf %12, %13 : vector<128x128xf32>
    %cst_12 = arith.constant 0.000000e+00 : f32
    %15 = vector.broadcast %cst_12 : f32 to vector<128x128xf32>
    %16 = arith.maximumf %14, %15 : vector<128x128xf32>
    %17 = vector.shape_cast %16 : vector<128x128xf32> to vector<8x16x128xf32>
    %cst_13 = arith.constant dense<0xFF800000> : vector<8x128xf32>
    %18 = vector.multi_reduction <maximumf>, %17, %cst_13 [1] : vector<8x16x128xf32> to vector<8x128xf32>
    %c0_14 = arith.constant 0 : index
    %c0_15 = arith.constant 0 : index
    %c0_16 = arith.constant 0 : index
    %19 = vector.load %arg7[%c0_14, %c0_15, %c0_16] : memref<1x8x128xf32, #tpu.memory_space<vmem>>, vector<1x8x128xf32>
    %20 = vector.shape_cast %19 : vector<1x8x128xf32> to vector<8x128xf32>
    %21 = vector.shape_cast %18 : vector<8x128xf32> to vector<1x8x128xf32>
    tpu.vector_store %arg7[%c0_14, %c0_15, %c0_16], %21 {strides = array<i32>} : memref<1x8x128xf32, #tpu.memory_space<vmem>>, vector<1x8x128xf32>,
    return
  }
  func.func @transform_0(%arg0: i32, %arg1: i32) -> (i32, i32, i32) {
    %c0_i32 = arith.constant 0 : i32
    %c0_i32_0 = arith.constant 0 : i32
    return %arg0, %arg1, %c0_i32 : i32, i32, i32
  }
  func.func @transform_1(%arg0: i32, %arg1: i32) -> (i32, i32) {
    %c0_i32 = arith.constant 0 : i32
    %c0_i32_0 = arith.constant 0 : i32
    %c0_i32_1 = arith.constant 0 : i32
    return %c0_i32, %c0_i32_0 : i32, i32
  }
  func.func @transform_2(%arg0: i32, %arg1: i32) -> (i32, i32) {
    %c0_i32 = arith.constant 0 : i32
    %c0_i32_0 = arith.constant 0 : i32
    %c0_i32_1 = arith.constant 0 : i32
    return %c0_i32, %c0_i32_0 : i32, i32
  }
  func.func @transform_3(%arg0: i32, %arg1: i32) -> (i32, i32) {
    %c0_i32 = arith.constant 0 : i32
    %c0_i32_0 = arith.constant 0 : i32
    %c0_i32_1 = arith.constant 0 : i32
    return %c0_i32, %c0_i32_0 : i32, i32
  }
  func.func @transform_4(%arg0: i32, %arg1: i32) -> (i32, i32) {
    %c0_i32 = arith.constant 0 : i32
    %c0_i32_0 = arith.constant 0 : i32
    %c0_i32_1 = arith.constant 0 : i32
    return %c0_i32, %c0_i32_0 : i32, i32
  }
  func.func @transform_5(%arg0: i32, %arg1: i32) -> (i32, i32, i32) {
    %c0_i32 = arith.constant 0 : i32
    %c0_i32_0 = arith.constant 0 : i32
    return %arg0, %arg1, %c0_i32 : i32, i32, i32
  }
}

</mosaic_0001>

<bundles_post_ra>
// kernel: tpu_custom_call.1
= control target key start
LH: loop header
LB: loop body
LE: loop exit
PB: predicated region body
PF: predicated region fallthrough
CT: control target
= control target key end

     0   :  { %10 = vsyncpa [#allocation3], 0  ;;  %s1087_s0 = inlined_call_operand.vmem [shape: bf16[2,128,16], index: 0, kind: input, shape index: {}]   ;;  %s1088_s1 = inlined_call_operand.vmem [shape: bf16[16,16], index: 1, kind: input, shape index: {}]   ;;  %s1089_s2 = inlined_call_operand.vmem [shape: f32[1,16], index: 2, kind: input, shape index: {}]   ;;  %s1090_s3 = inlined_call_operand.vmem [shape: bf16[16,128], index: 3, kind: input, shape index: {}]   ;;  %s1091_s4 = inlined_call_operand.vmem [shape: f32[1,128], index: 4, kind: input, shape index: {}]   ;;  %s1092_s5 = inlined_call_operand.hbm [shape: f32[2,8,128], index: 5, kind: output, shape index: {}]  }
   0x1   :  { %12 = vsyncpa [#allocation3 + $0x1], 0  ;;  %s940_s18 = smov 0   ;;  %s942_s19 = smov 0  }
   0x2   :  { %s944_s20 = smov 0   ;;  %s946_s21 = smov 0  }
   0x3   :  { %s948_s22 = smov 0   ;;  %s950_s23 = smov 0  }
   0x4 LB: > { %s692_s24 = sadd.s32 4294967295, %s908_s23   ;;  %s693_s25 = sadd.s32 4294967294, %s908_s23   ;;  %s908_s23 = sphi %s950_s23, %s18_s23   ;;  %s904_s22 = sphi %s948_s22, %s1099_s22   ;;  %s900_s21 = sphi %s946_s21, %s1098_s21   ;;  %s896_s20 = sphi %s944_s20, %s1097_s20   ;;  %s892_s19 = sphi %s942_s19, %s1096_s19   ;;  %s888_s18 = sphi %s940_s18, %s1095_s18  }
   0x5   : > { %s30_s26 = sadd.s32 1, %s904_s22  ;;  %s151_s27 = sadd.s32 1, %s896_s20 }
   0x6   : > { %p32_p0 = scmp.ge.s32.totalorder %s30_s26, 2  ;;  %p161_p1 = scmp.ne.s32.totalorder %s896_s20, %s892_s19 }
   0x7   : > { %p162_p2 = scmp.eq.s32.totalorder %s692_s24, 1  ;;  %p167_p3 = scmp.ne.s32.totalorder %s892_s19, %s888_s18 }
   0x8   : > { %s1101_s26 = smov (%p32_p0, %s30_s26), 0  ;;  %p168_p5 = scmp.eq.s32.totalorder %s693_s25, 1 }
   0x9   : > { %p980_p4 = por %p162_p2, %p161_p1  ;;  %s146_s29 = ssub.s32 %s904_s22, %s1101_s26 }
   0xa   : > { %p696_p6 = scmp.ge.s32.totalorder %s908_s23, 1  ;;  %p149_p7 = scmp.eq.s32.totalorder %s146_s29, 0 }
   0xb   : > { %p987_p8 = por %p168_p5, %p167_p3  ;;  %p211_p9 = scmp.lt.s32.totalorder %s908_s23, 3 }
   0xc   : > { %s993_s6 = scalar_select %p149_p7, %s896_s20, %s151_s27  }
   0xd   : > { %p212_p10 = pnand %p696_p6, %p211_p9 }
   0xe   : > { %p244_p11 = scmp.lt.s32.totalorder (!%p212_p10), %s900_s21, 1  ;;  %s240_s27 = sand.u32 (!%p212_p10), 1, %s892_s19  }
   0xf   : > { %215 = sbr.rel (%p212_p10) target bundleno = 382 (0x17e), region = 40  ;;  %s697_s29 = sshll.u32 (!%p212_p10), %s240_s27, 3 }
  0x10   : > { %s757_s7 = sshll.u32 (!%p212_p10), %s900_s21, 3  ;;  %s242_s11 = scalar_lea.vmem (!%p212_p10), [#allocation2], %s697_s29 }
  0x11   : > { %s615_s12 = sshll.u32 (!%p212_p10), %s242_s11, 4  ;;  %s850_s24 = scalar_lea.hbm (!%p212_p10), %s1092_s5, 16  ;;  %s616_s12 = int_to_ptr.vmem [resolvable:$true] %s615_s12 }
  0x14   : > { %v769_v0 = vld [vmem:[%s1088_s1] sm:$0xff]  ;;  %s245_s9 = scalar_select %p244_p11, %s900_s21, 1  ;;  %vm322_vm0 = vcmask 130048   ;;  %vm585_vm1 = vcmask 1041409   ;;  %vm587_vm2 = vcmask 1042434   ;;  %vm589_vm3 = vcmask 1043459  }
  0x15   : > { %354 = vmatpush.bf16.msra.mxu0 %v769_v0  ;;  %771 = vmatpush.bf16.msra.mxu2 %v769_v0  ;;  %v770_v9 = vld [vmem:[%s1090_s3] sm:$0xff]  ;;  %vm591_vm4 = vcmask 1044484   ;;  %vm593_vm5 = vcmask 1045509   ;;  %vm595_vm6 = vcmask 1046534   ;;  %vm597_vm7 = vcmask 1047559   ;;  %s602_s21 = scalar_lea.sflag [#allocation3], %s240_s27 }
  0x16   : > { %s760_s10 = sshll.u32 %s245_s9, 6  ;;  %463 = vmatpush.bf16.msra.mxu1 %v770_v9  ;;  %772 = vmatpush.bf16.msra.mxu3 %v770_v9  ;;  %v828_v11 = vld [vmem:[%s1089_s2] ss:$0 sm:$0xff] }
  0x17   : > { %s251_s13 = scalar_lea.vmem %s1087_s0, %s760_s10  ;;  %s613_s10 = scalar_lea.hbm %s1092_s5, %s757_s7 }
  0x18   : > { %v761_v1 = vld [vmem:[%s251_s13] sm:$0xff]  ;;  %v762_v3 = vld [vmem:[%s251_s13 + $0x8] sm:$0xff]  ;;  %v763_v5 = vld [vmem:[%s251_s13 + $0x10] sm:$0xff] }
  0x19   : > { %v765_v2 = vld [vmem:[%s251_s13 + $0x20] sm:$0xff]  ;;  %736 = vmatmul.msk.bf16.vlgmr.msra.gmra.mxu0 %vm322_vm0, %v761_v1  ;;  %v766_v4 = vld [vmem:[%s251_s13 + $0x28] sm:$0xff]  ;;  %v767_v6 = vld [vmem:[%s251_s13 + $0x30] sm:$0xff] }
  0x1a   : > { %740 = vmatmul.msk.bf16.vlgmr.msra.gmra.mxu2 %vm322_vm0, %v765_v2  ;;  %v764_v7 = vld [vmem:[%s251_s13 + $0x18] sm:$0xff] }
  0x1b   : > { %v768_v8 = vld [vmem:[%s251_s13 + $0x38] sm:$0xff]  ;;  %s617_s13 = sshll.u32 %s613_s10, 4  ;;  %s618_s13 = int_to_ptr.hbm [resolvable:$true] %s617_s13 }
  0x1c   : > { %s844_s14 = sshra.s32 %s618_s13, 4  ;;  %s845_s14 = int_to_ptr.hbm [resolvable:$true] %s844_s14 }
  0x1d   : > { %s846_s15 = scalar_lea.hbm %s845_s14, 8  ;;  %p851_p1 = scmp.lt.s32.totalorder %s845_s14, %s1092_s5 }
  0x1e   : > { %p847_p12 = scmp.ne.s32.totalorder %s845_s14, %s846_s15  ;;  %p852_p2 = scmp.lt.s32.totalorder %s850_s24, %s846_s15 }
  0x20   : > { %p848_p13 = pnand %p847_p12, %p980_p4  ;;  %p853_p3 = por %p852_p2, %p851_p1 }
  0x22   : > { %p849_p0 = pneg %p848_p13 }
  0x24   : > { %p854_p5 = pnand %p853_p3, %p849_p0 }
  0x29   : > { %737 = vmatmul.msk.bf16.gmra.mxu0 %vm322_vm0, %v762_v3 }
  0x2a   : > { %741 = vmatmul.msk.bf16.gmra.mxu2 %vm322_vm0, %v766_v4 }
  0x39   : > { %738 = vmatmul.msk.bf16.gmra.mxu0 %vm322_vm0, %v763_v5 }
  0x3a   : > { %742 = vmatmul.msk.bf16.gmra.mxu2 %vm322_vm0, %v767_v6 }
  0x49   : > { %739 = vmatmul.msk.bf16.gmra.mxu0 %vm322_vm0, %v764_v7 }
  0x4a   : > { %743 = vmatmul.msk.bf16.gmra.mxu2 %vm322_vm0, %v768_v8 }
  0x96   : > { %v356_v10 = vpop.f32.mrf.mxu0 }
  0x97   : > { %v357_v12 = vadd.f32 %v828_v11, %v356_v10 }
  0x99   : > { %v396_v15 = vmax.f32 %v357_v12, 0.0 }
  0x9d   : > { %v376_v13 = vpop.f32.mrf.mxu2 }
  0x9e   : > { %v358_v14 = vpop.f32.mrf.mxu0  ;;  %v377_v18 = vadd.f32 %v828_v11, %v376_v13 }
  0x9f   : > { %v359_v16 = vadd.f32 %v828_v11, %v358_v14 }
  0xa0   : > { %v404_v23 = vmax.f32 %v377_v18, 0.0 }
  0xa1   : > { %v397_v17 = vmax.f32 %v359_v16, 0.0 }
  0xa3   : > { %v412_v19 = vpack.c.bf16 %v397_v17, %v396_v15 }
  0xa5   : > { %v378_v20 = vpop.f32.mrf.mxu2  ;;  %748 = vmatmul.msk.bf16.vlgmr.msra.gmra.mxu1 %vm322_vm0, %v412_v19 }
  0xa6   : > { %v379_v21 = vadd.f32 %v828_v11, %v378_v20  ;;  %v361_v22 = vpop.f32.mrf.mxu0 }
  0xa7   : > { %v362_v26 = vadd.f32 %v828_v11, %v361_v22 }
  0xa8   : > { %v405_v24 = vmax.f32 %v379_v21, 0.0 }
  0xa9   : > { %v398_v29 = vmax.f32 %v362_v26, 0.0 }
  0xaa   : > { %v416_v25 = vpack.c.bf16 %v405_v24, %v404_v23 }
  0xac   : > { %752 = vmatmul.msk.bf16.vlgmr.msra.gmra.mxu3 %vm322_vm0, %v416_v25 }
  0xad   : > { %v381_v27 = vpop.f32.mrf.mxu2 }
  0xae   : > { %v363_v28 = vpop.f32.mrf.mxu0  ;;  %v382_v32 = vadd.f32 %v828_v11, %v381_v27 }
  0xaf   : > { %v364_v30 = vadd.f32 %v828_v11, %v363_v28 }
  0xb0   : > { %v406_v37 = vmax.f32 %v382_v32, 0.0 }
  0xb1   : > { %v399_v31 = vmax.f32 %v364_v30, 0.0 }
  0xb3   : > { %v413_v33 = vpack.c.bf16 %v399_v31, %v398_v29 }
  0xb5   : > { %v383_v34 = vpop.f32.mrf.mxu2  ;;  %749 = vmatmul.msk.bf16.gmra.mxu1 %vm322_vm0, %v413_v33 }
  0xb6   : > { %v384_v35 = vadd.f32 %v828_v11, %v383_v34  ;;  %v366_v36 = vpop.f32.mrf.mxu0 }
  0xb7   : > { %v367_v40 = vadd.f32 %v828_v11, %v366_v36 }
  0xb8   : > { %v407_v38 = vmax.f32 %v384_v35, 0.0 }
  0xb9   : > { %v400_v43 = vmax.f32 %v367_v40, 0.0 }
  0xba   : > { %v417_v39 = vpack.c.bf16 %v407_v38, %v406_v37 }
  0xbc   : > { %753 = vmatmul.msk.bf16.gmra.mxu3 %vm322_vm0, %v417_v39 }
  0xbd   : > { %v386_v41 = vpop.f32.mrf.mxu2 }
  0xbe   : > { %v368_v42 = vpop.f32.mrf.mxu0  ;;  %v387_v46 = vadd.f32 %v828_v11, %v386_v41 }
  0xbf   : > { %v369_v44 = vadd.f32 %v828_v11, %v368_v42 }
  0xc0   : > { %v408_v51 = vmax.f32 %v387_v46, 0.0 }
  0xc1   : > { %v401_v45 = vmax.f32 %v369_v44, 0.0 }
  0xc3   : > { %v414_v47 = vpack.c.bf16 %v401_v45, %v400_v43 }
  0xc5   : > { %v388_v48 = vpop.f32.mrf.mxu2  ;;  %750 = vmatmul.msk.bf16.gmra.mxu1 %vm322_vm0, %v414_v47 }
  0xc6   : > { %v389_v49 = vadd.f32 %v828_v11, %v388_v48  ;;  %v371_v50 = vpop.f32.mrf.mxu0 }
  0xc7   : > { %v372_v54 = vadd.f32 %v828_v11, %v371_v50 }
  0xc8   : > { %v409_v52 = vmax.f32 %v389_v49, 0.0 }
  0xc9   : > { %v402_v57 = vmax.f32 %v372_v54, 0.0 }
  0xca   : > { %v418_v53 = vpack.c.bf16 %v409_v52, %v408_v51 }
  0xcc   : > { %754 = vmatmul.msk.bf16.gmra.mxu3 %vm322_vm0, %v418_v53 }
  0xcd   : > { %v391_v55 = vpop.f32.mrf.mxu2 }
  0xce   : > { %v373_v56 = vpop.f32.mrf.mxu0  ;;  %v392_v60 = vadd.f32 %v828_v11, %v391_v55 }
  0xcf   : > { %v374_v58 = vadd.f32 %v828_v11, %v373_v56 }
  0xd0   : > { %v410_v0 = vmax.f32 %v392_v60, 0.0 }
  0xd1   : > { %v403_v59 = vmax.f32 %v374_v58, 0.0 }
  0xd3   : > { %v415_v61 = vpack.c.bf16 %v403_v59, %v402_v57 }
  0xd5   : > { %v393_v62 = vpop.f32.mrf.mxu2  ;;  %751 = vmatmul.msk.bf16.gmra.mxu1 %vm322_vm0, %v415_v61 }
  0xd6   : > { %v394_v63 = vadd.f32 %v828_v11, %v393_v62  ;;  %v1028_v11 = vld [vmem:[%s1091_s4] ss:$0 sm:$0xff] }
  0xd8   : > { %v411_v1 = vmax.f32 %v394_v63, 0.0 }
  0xda   : > { %v419_v2 = vpack.c.bf16 %v411_v1, %v410_v0 }
  0xdc   : > { %755 = vmatmul.msk.bf16.gmra.mxu3 %vm322_vm0, %v419_v2 }
 0x122   : > { %v465_v3 = vpop.f32.mrf.mxu1 }
 0x123   : > { %v466_v18 = vadd.f32 %v1028_v11, %v465_v3 }
 0x125   : > { %v505_v25 = vmax.f32 %v466_v18, 0.0 }
 0x12a   : > { %v467_v4 = vpop.f32.mrf.mxu1 }
 0x12b   : > { %v468_v14 = vadd.f32 %v1028_v11, %v467_v4 }
 0x12d   : > { %v506_v21 = vmax.f32 %v468_v14, 0.0 }
 0x12f   : > { %v485_v5 = vpop.f32.mrf.mxu3  ;;  %v521_v29 = vmax.f32 %v505_v25, %v506_v21 }
 0x130   : > { %v486_v30 = vadd.f32 %v1028_v11, %v485_v5 }
 0x131   : > { %v522_v37 = vrot.slane %v521_v29, 4 }
 0x132   : > { %v470_v6 = vpop.f32.mrf.mxu1  ;;  %v513_v38 = vmax.f32 %v486_v30, 0.0 }
 0x133   : > { %v471_v16 = vadd.f32 %v1028_v11, %v470_v6  ;;  %v523_v48 = vmax.f32 %v521_v29, %v522_v37 }
 0x135   : > { %v507_v24 = vmax.f32 %v471_v16, 0.0  ;;  %v524_v59 = vrot.slane %v523_v48, 2 }
 0x137   : > { %v487_v7 = vpop.f32.mrf.mxu3  ;;  %v525_v4 = vmax.f32 %v523_v48, %v524_v59 }
 0x138   : > { %v488_v26 = vadd.f32 %v1028_v11, %v487_v7 }
 0x139   : > { %v526_v14 = vrot.slane %v525_v4, 1 }
 0x13a   : > { %v472_v8 = vpop.f32.mrf.mxu1  ;;  %v514_v34 = vmax.f32 %v488_v26, 0.0 }
 0x13b   : > { %v473_v13 = vadd.f32 %v1028_v11, %v472_v8  ;;  %v527_v26 = vmax.f32 %v525_v4, %v526_v14 }
 0x13c   : > { %v549_v43 = vmax.f32 %v513_v38, %v514_v34 }
 0x13d   : > { %v508_v20 = vmax.f32 %v473_v13, 0.0 }
 0x13e   : > { %v550_v54 = vrot.slane %v549_v43, 4 }
 0x13f   : > { %v490_v9 = vpop.f32.mrf.mxu3  ;;  %v528_v28 = vmax.f32 %v507_v24, %v508_v20 }
 0x140   : > { %v491_v36 = vadd.f32 %v1028_v11, %v490_v9  ;;  %v551_v1 = vmax.f32 %v549_v43, %v550_v54 }
 0x141   : > { %v529_v35 = vrot.slane %v528_v28, 4 }
 0x142   : > { %v475_v10 = vpop.f32.mrf.mxu1  ;;  %v515_v46 = vmax.f32 %v491_v36, 0.0  ;;  %v552_v9 = vrot.slane %v551_v1, 2 }
 0x143   : > { %v476_v19 = vadd.f32 %v1028_v11, %v475_v10  ;;  %v530_v45 = vmax.f32 %v528_v28, %v529_v35 }
 0x144   : > { %v553_v21 = vmax.f32 %v551_v1, %v552_v9 }
 0x145   : > { %v509_v27 = vmax.f32 %v476_v19, 0.0  ;;  %v531_v56 = vrot.slane %v530_v45, 2 }
 0x147   : > { %v492_v12 = vpop.f32.mrf.mxu3  ;;  %v532_v2 = vmax.f32 %v530_v45, %v531_v56 }
 0x148   : > { %v493_v33 = vadd.f32 %v1028_v11, %v492_v12 }
 0x149   : > { %v533_v10 = vrot.slane %v532_v2, 1 }
 0x14a   : > { %v477_v15 = vpop.f32.mrf.mxu1  ;;  %v516_v41 = vmax.f32 %v493_v33, 0.0 }
 0x14b   : > { %v478_v17 = vadd.f32 %v1028_v11, %v477_v15 }
 0x14c   : > { %v556_v52 = vmax.f32 %v515_v46, %v516_v41 }
 0x14d   : > { %v510_v22 = vmax.f32 %v478_v17, 0.0 }
 0x14e   : > { %v557_v63 = vrot.slane %v556_v52, 4 }
 0x14f   : > { %v495_v23 = vpop.f32.mrf.mxu3  ;;  %v535_v31 = vmax.f32 %v509_v27, %v510_v22  ;;  %v534_v22 = vmax.f32 %v532_v2, %v533_v10 }
 0x150   : > { %v496_v44 = vadd.f32 %v1028_v11, %v495_v23  ;;  %v558_v7 = vmax.f32 %v556_v52, %v557_v63 }
 0x151   : > { %v536_v39 = vrot.slane %v535_v31, 4  ;;  %v586_v33 = vsel %vm585_vm1, %v534_v22, %v527_v26 }
 0x152   : > { %v480_v32 = vpop.f32.mrf.mxu1  ;;  %v517_v55 = vmax.f32 %v496_v44, 0.0  ;;  %v559_v18 = vrot.slane %v558_v7, 2 }
 0x153   : > { %v481_v47 = vadd.f32 %v1028_v11, %v480_v32  ;;  %v537_v49 = vmax.f32 %v535_v31, %v536_v39  ;;  %v554_v32 = vrot.slane %v553_v21, 1 }
 0x154   : > { %v560_v29 = vmax.f32 %v558_v7, %v559_v18 }
 0x155   : > { %v511_v57 = vmax.f32 %v481_v47, 0.0  ;;  %v538_v60 = vrot.slane %v537_v49, 2  ;;  %v555_v39 = vmax.f32 %v553_v21, %v554_v32 }
 0x156   : > { %v561_v36 = vrot.slane %v560_v29, 1 }
 0x157   : > { %v497_v40 = vpop.f32.mrf.mxu3  ;;  %v539_v5 = vmax.f32 %v537_v49, %v538_v60 }
 0x158   : > { %v498_v42 = vadd.f32 %v1028_v11, %v497_v40  ;;  %v562_v43 = vmax.f32 %v560_v29, %v561_v36 }
 0x159   : > { %v540_v15 = vrot.slane %v539_v5, 1 }
 0x15a   : > { %v518_v50 = vmax.f32 %v498_v42, 0.0  ;;  %v482_v51 = vpop.f32.mrf.mxu1 }
 0x15b   : > { %v483_v53 = vadd.f32 %v1028_v11, %v482_v51  ;;  %v541_v27 = vmax.f32 %v539_v5, %v540_v15 }
 0x15c   : > { %v563_v61 = vmax.f32 %v517_v55, %v518_v50 }
 0x15d   : > { %v512_v58 = vmax.f32 %v483_v53, 0.0  ;;  %v588_v34 = vsel %vm587_vm2, %v541_v27, %v586_v33 }
 0x15e   : > { %v564_v6 = vrot.slane %v563_v61, 4 }
 0x15f   : > { %v500_v62 = vpop.f32.mrf.mxu3  ;;  %v542_v0 = vmax.f32 %v511_v57, %v512_v58 }
 0x160   : > { %v501_v13 = vadd.f32 %v1028_v11, %v500_v62  ;;  %v565_v16 = vmax.f32 %v563_v61, %v564_v6 }
 0x161   : > { %v543_v3 = vrot.slane %v542_v0, 4 }
 0x162   : > { %v519_v24 = vmax.f32 %v501_v13, 0.0  ;;  %v566_v28 = vrot.slane %v565_v16, 2 }
 0x163   : > { %v544_v8 = vmax.f32 %v542_v0, %v543_v3 }
 0x164   : > { %v567_v35 = vmax.f32 %v565_v16, %v566_v28 }
 0x165   : > { %v545_v12 = vrot.slane %v544_v8, 2 }
 0x166   : > { %v568_v41 = vrot.slane %v567_v35, 1 }
 0x167   : > { %v502_v17 = vpop.f32.mrf.mxu3  ;;  %v546_v19 = vmax.f32 %v544_v8, %v545_v12 }
 0x168   : > { %v503_v20 = vadd.f32 %v1028_v11, %v502_v17  ;;  %v569_v47 = vmax.f32 %v567_v35, %v568_v41 }
 0x169   : > { %v547_v23 = vrot.slane %v546_v19, 1 }
 0x16a   : > { %v520_v25 = vmax.f32 %v503_v20, 0.0 }
 0x16b   : > { %v548_v30 = vmax.f32 %v546_v19, %v547_v23 }
 0x16c   : > { %v570_v31 = vmax.f32 %v519_v24, %v520_v25 }
 0x16d   : > { %v590_v38 = vsel %vm589_vm3, %v548_v30, %v588_v34 }
 0x16e   : > { %v571_v11 = vrot.slane %v570_v31, 4  ;;  %v592_v42 = vsel %vm591_vm4, %v555_v39, %v590_v38 }
 0x16f   : > { %v594_v46 = vsel %vm593_vm5, %v562_v43, %v592_v42 }
 0x170   : > { %v572_v37 = vmax.f32 %v570_v31, %v571_v11  ;;  %v596_v49 = vsel %vm595_vm6, %v569_v47, %v594_v46 }
 0x172   : > { %v573_v40 = vrot.slane %v572_v37, 2 }
 0x174   : > { %v574_v44 = vmax.f32 %v572_v37, %v573_v40 }
 0x176   : > { %v575_v45 = vrot.slane %v574_v44, 1 }
 0x178   : > { %v576_v48 = vmax.f32 %v574_v44, %v575_v45 }
 0x17a   : > { %v598_v50 = vsel %vm597_vm7, %v576_v48, %v596_v49 }
 0x17b   : > { %600 = vst [vmem:[%s242_s11] sm:$0xff] %v598_v50 }
 0x17c   : > { %857 = shalt.err (!%p854_p5)
}
 0x17d   : > { %773 = dma.vmem_to_hbm [thread:$0]  (%p980_p4), %s616_s12, 128, %s618_s13, %s602_s21  }
 0x17e PF: > { %p779_p6 = scmp.ge.s32.totalorder %s908_s23, 2  ;;  %s629_s27 = sand.u32 1, %s888_s18  }
 0x17f   : > { %s630_s7 = scalar_lea.sflag [#allocation3], %s629_s27 }
 0x180   : > { %p776_p7 = pnand %p779_p6, %p987_p8 }
 0x182   : > { %p777_p9 = pneg %p776_p7 }
 0x184   : > { %883 = dma.done.wait (%p777_p9), %s630_s7, 128  }
 0x185   : > { %885 = vsyncadd (%p777_p9), %s630_s7, 4294967168  ;;  %s18_s23 = sadd.s32 1, %s908_s23   ;;  %s1095_s18 = smov %s892_s19 }
 0x186   : > { %p15_p10 = scmp.ge.s32.totalorder %s18_s23, 4   ;;  %s1096_s19 = smov %s896_s20 }
 0x187   : > { %s1097_s20 = smov %s993_s6  ;;  %s1098_s21 = smov %s904_s22 }
 0x188   : > { %s1099_s22 = smov %s1101_s26  ;;  %17 = sbr.rel (!%p15_p10) target bundleno = 4 (0x4), region = 75 }
 0x18d   :  { %636 = vsyncpa [#allocation3], 1 }
 0x18e   :  { %638 = vsyncpa [#allocation3 + $0x1], 1 }

</bundles_post_ra>
